<compile_context>
chip_gen: v6e
topology: v6e:2x2x1
jax: 0.10.0
libtpu: 0.0.40
codegen_flags: <defaults>
</compile_context>

<pallas_src>
import functools

import jax
import jax.numpy as jnp
from jax import lax
from jax.experimental import pallas as pl
from jax.experimental.pallas import tpu as pltpu


def _tpu_generation_defaults():
    """(core_splits, per-input tile byte target) for the attached TPU."""
    try:
        kind = jax.devices()[0].device_kind.lower()
    except Exception:
        kind = ""
    if "v7" in kind or "7x" in kind:
        # 2 TensorCores/chip; 64 MiB physical VMEM -> ~2.5 MiB tiles.
        return 2, (5 << 20) // 2
    if "v5 lite" in kind or "v5e" in kind or "v5lite" in kind:
        # 1 TC; 16 MiB scoped-VMEM default -> ~2 MiB tiles.
        return 1, 2 << 20
    # v6e / default: 1 TC, plenty of VMEM -> ~4 MiB tiles.
    return 1, 4 << 20


def _choose_layout(shape):
    """Pick a FREE (rows, width) reshape of the flattened element stream,
    preferring a lane-dense width (multiple of 128)."""
    n_elems = 1
    for d in shape:
        n_elems *= int(d)
    last = int(shape[-1]) if len(shape) else 1
    if last % 128 == 0 and last <= 4096:
        return n_elems // last, last
    for w in (1024, 512, 256, 128):       # free refactorization if it divides
        if n_elems % w == 0:
            return n_elems // w, w
    return n_elems // last, last           # narrow / unaligned fallback


def _binarization_loss_kernel(hard_ref, soft_ref, logp_out_ref, count_out_ref,
                              logp_acc, count_acc, *,
                              tiles_per_core, tile_rows, chunk_rows, total_rows):
    c = pl.program_id(0)          # core-split axis ("parallel")
    i = pl.program_id(1)          # row-tile reduction axis ("arbitrary")
    width = hard_ref.shape[-1]
    n_chunks = tile_rows // chunk_rows
    # Logical (unclamped) first row of this tile: phantom / ragged-tail tiles
    # are detected against the true row count.
    tile_row0 = (c * tiles_per_core + i) * tile_rows

    @pl.when(i == 0)
    def _init():
        logp_acc[...] = jnp.zeros_like(logp_acc)
        count_acc[...] = jnp.zeros_like(count_acc)

    def accumulate_chunk(r0, masked):
        h = hard_ref[pl.ds(r0, chunk_rows), :].astype(jnp.float32)
        s = soft_ref[pl.ds(r0, chunk_rows), :].astype(jnp.float32)
        if masked:
            row_ids = tile_row0 + r0 + lax.broadcasted_iota(jnp.int32, h.shape, 0)
            valid = row_ids < total_rows
            sel = (h == 1.0) & valid
            cnt = jnp.where(valid, h, 0.0)
        else:
            sel = h == 1.0
            cnt = h
        # jnp.where is a true select: log() of block-padding garbage / zeros is
        # computed but never contaminates the sum (do NOT turn into mask*log).
        logs = jnp.where(sel, jnp.log(s), 0.0)
        # Reduce the chunk to the vreg-height (8, width) slab with pure VPU adds.
        logp_acc[...] += logs.reshape(chunk_rows // 8, 8, width).sum(axis=0)
        count_acc[...] += cnt.reshape(chunk_rows // 8, 8, width).sum(axis=0)

    def run_tile(masked):
        if n_chunks == 1:
            accumulate_chunk(0, masked)
        else:
            @pl.loop(0, n_chunks)
            def _(k):
                accumulate_chunk(pl.multiple_of(k * chunk_rows, chunk_rows), masked)

    # Interior fast path: no iota / validity selects in the steady state.
    is_edge = tile_row0 + tile_rows > total_rows

    @pl.when(jnp.logical_not(is_edge))
    def _interior():
        run_tile(False)

    @pl.when(is_edge)
    def _edge():
        run_tile(True)

    # Finalize once per core: collapse the (8, width) slabs to scalar partials.
    @pl.when(i == tiles_per_core - 1)
    def _finalize():
        logp_out_ref[...] = jnp.sum(logp_acc[...]).reshape(1, 1, 1)
        count_out_ref[...] = jnp.sum(count_acc[...]).reshape(1, 1, 1)


def attention_binarization_loss(hard_attention, soft_attention):
    """hard/soft attention maps of identical shape (e.g. (B, 1, T_mel, T_text)),
    any float dtype -> scalar f32 loss."""
    assert hard_attention.shape == soft_attention.shape
    shape = hard_attention.shape
    rows, width = _choose_layout(shape)
    total_rows = rows

    # Free (metadata-only) reshape of the contiguous element stream.  No dtype
    # cast here: inputs are DMA'd in their native dtype.
    hard2d = hard_attention.reshape(rows, width)
    soft2d = soft_attention.reshape(rows, width)

    num_splits, target_tile_bytes = _tpu_generation_defaults()

    # --- Byte-targeted tile-size selection ------------------------------------
    isz_h = jnp.dtype(hard2d.dtype).itemsize
    isz_s = jnp.dtype(soft2d.dtype).itemsize
    padded_w = -(-width // 128) * 128                  # lane-padded VMEM width
    bytes_per_row = padded_w * max(isz_h, isz_s)
    rows_target = max(8, (target_tile_bytes // bytes_per_row) // 8 * 8)
    chunk_rows = min(256, rows_target)                 # in-kernel vreg-slab unit

    if rows >= chunk_rows:
        # Big path: byte-targeted tiles, ragged tail masked in-kernel (no pad copy).
        tile_rows = max(chunk_rows,
                        (min(rows, rows_target) // chunk_rows) * chunk_rows)
    else:
        # Tiny input: single sublane-aligned tile; the pad copy is negligible here.
        tile_rows = -(-rows // 8) * 8
        chunk_rows = tile_rows
        pad = tile_rows - rows
        if pad:
            hard2d = jnp.pad(hard2d, ((0, pad), (0, 0)))
            soft2d = jnp.pad(soft2d, ((0, pad), (0, 0)), constant_values=1.0)
        rows = tile_rows

    n_row_blocks = pl.cdiv(rows, tile_rows)
    if num_splits > n_row_blocks:
        num_splits = 1
    tiles_per_core = pl.cdiv(n_row_blocks, num_splits)
    last_block = n_row_blocks - 1

    def in_index_map(ci, ti):
        # Clamp so phantom tiles (core-split round-up) never DMA out of bounds;
        # their contribution is masked to zero in-kernel.
        return (jnp.minimum(ci * tiles_per_core + ti, last_block), 0)

    kernel = functools.partial(
        _binarization_loss_kernel,
        tiles_per_core=tiles_per_core,
        tile_rows=tile_rows,
        chunk_rows=chunk_rows,
        total_rows=total_rows,
    )

    n_elems = total_rows * width
    cost = pl.CostEstimate(
        flops=6 * n_elems,
        transcendentals=n_elems,
        bytes_accessed=n_elems * (isz_h + isz_s) + 8 * num_splits,
    )

    # 2 inputs x 2 pipeline buffers x lane-padded tile + accumulators + slack.
    est_vmem = (2 * tile_rows * padded_w * (isz_h + isz_s)
                + 2 * 8 * padded_w * 4
                + (6 << 20))
    vmem_limit = int(max(16 << 20, min(48 << 20, est_vmem)))

    logp_part, count_part = pl.pallas_call(
        kernel,
        grid=(num_splits, tiles_per_core),
        in_specs=[
            pl.BlockSpec((tile_rows, width), in_index_map),
            pl.BlockSpec((tile_rows, width), in_index_map),
        ],
        out_specs=[
            pl.BlockSpec((1, 1, 1), lambda ci, ti: (ci, 0, 0)),
            pl.BlockSpec((1, 1, 1), lambda ci, ti: (ci, 0, 0)),
        ],
        out_shape=[
            jax.ShapeDtypeStruct((num_splits, 1, 1), jnp.float32),
            jax.ShapeDtypeStruct((num_splits, 1, 1), jnp.float32),
        ],
        scratch_shapes=[
            pltpu.VMEM((8, width), jnp.float32),
            pltpu.VMEM((8, width), jnp.float32),
        ],
        compiler_params=pltpu.CompilerParams(
            # TODO(synk): verify on v7x (xprof) that "parallel" actually shards
            # the leading core-split axis across both TensorCores; if not,
            # switch that axis to pltpu.CORE_PARALLEL.
            dimension_semantics=("parallel", "arbitrary"),
            vmem_limit_bytes=vmem_limit,
        ),
        cost_estimate=cost,
    )(hard2d, soft2d)

    # Trivial epilogue on per-core scalar partials.
    log_sum = jnp.sum(logp_part)
    hard_sum = jnp.sum(count_part)
    # Note: an all-zero hard_attention yields inf/nan, matching the PyTorch ref.
    # TODO(synk): on v7x with bf16 inputs, a one-hot-per-row precondition would
    # allow a lane-reduce-before-log rewrite (T_text x fewer EUP logs).
    return -log_sum / hard_sum


def _reference(hard_attention, soft_attention):
    mask = hard_attention == 1.0
    log_sum = jnp.sum(jnp.where(mask, jnp.log(soft_attention.astype(jnp.float32)), 0.0))
    return -log_sum / jnp.sum(hard_attention.astype(jnp.float32))


def _make_inputs(key, b, c, t_mel, t_text):
    logits = jax.random.normal(key, (b, c, t_mel, t_text), dtype=jnp.float32)
    soft = jax.nn.softmax(logits, axis=-1)
    hard = jax.nn.one_hot(jnp.argmax(soft, axis=-1), t_text, dtype=jnp.float32)
    return hard, soft


if __name__ == "__main__":
    key = jax.random.PRNGKey(0)
    k1, k2, k3, k4 = jax.random.split(key, 4)

    # Test 1: tiny shape -> single padded tile, narrow-lane fallback, edge masking.
    hard1, soft1 = _make_inputs(k1, 2, 1, 15, 8)
    loss1 = jax.block_until_ready(attention_binarization_loss(hard1, soft1))
    ref1 = _reference(hard1, soft1)
    assert jnp.allclose(loss1, ref1, rtol=1e-5, atol=1e-6), (loss1, ref1)

    # Test 2: larger shape -> multi-tile grid, interior fast path + ragged tail.
    hard2, soft2 = _make_inputs(k2, 2, 1, 550, 80)
    loss2 = jax.block_until_ready(attention_binarization_loss(hard2, soft2))
    ref2 = _reference(hard2, soft2)
    assert jnp.allclose(loss2, ref2, rtol=1e-5, atol=1e-6), (loss2, ref2)

    # Test 3: lane-aligned last dim -> interior-only (fully unmasked) path.
    hard3, soft3 = _make_inputs(k3, 2, 1, 64, 128)
    loss3 = jax.block_until_ready(attention_binarization_loss(hard3, soft3))
    ref3 = _reference(hard3, soft3)
    assert jnp.allclose(loss3, ref3, rtol=1e-5, atol=1e-6), (loss3, ref3)

    # Test 4: unaligned last dim but 128-divisible element count -> free
    # lane-dense refactorization of the flat element stream.
    hard4, soft4 = _make_inputs(k4, 2, 1, 32, 96)
    loss4 = jax.block_until_ready(attention_binarization_loss(hard4, soft4))
    ref4 = _reference(hard4, soft4)
    assert jnp.allclose(loss4, ref4, rtol=1e-5, atol=1e-6), (loss4, ref4)

    print("KERNEL_OK")
</pallas_src>

<mosaic_0001>
module attributes {stable_mosaic.version = 11 : i64} {
  func.func @_binarization_loss_kernel(%arg0: i32, %arg1: i32, %arg2: memref<32x8xf32, #tpu.memory_space<vmem>>, %arg3: memref<32x8xf32, #tpu.memory_space<vmem>>, %arg4: memref<1x1x1xf32, #tpu.memory_space<vmem>>, %arg5: memref<1x1x1xf32, #tpu.memory_space<vmem>>, %arg6: memref<8x8xf32, #tpu.memory_space<vmem>>, %arg7: memref<8x8xf32, #tpu.memory_space<vmem>>) attributes {dimension_semantics = [#tpu.dimension_semantics<parallel>, #tpu.dimension_semantics<arbitrary>], iteration_bounds = array<i64: 1, 1>, scalar_prefetch = 0 : i64, scratch_operands = 2 : i64, tpu.core_type = #tpu.core_type<tc>, window_params = [{transform_indices = @transform_0, window_bounds = array<i64: 32, 8>}, {transform_indices = @transform_1, window_bounds = array<i64: 32, 8>}, {transform_indices = @transform_2, window_bounds = array<i64: 1, 1, 1>}, {transform_indices = @transform_3, window_bounds = array<i64: 1, 1, 1>}]} {
    %c1_i32 = arith.constant 1 : i32
    %0 = arith.muli %arg0, %c1_i32 : i32
    %1 = arith.addi %0, %arg1 : i32
    %c32_i32 = arith.constant 32 : i32
    %2 = arith.muli %1, %c32_i32 : i32
    %c0_i32 = arith.constant 0 : i32
    %3 = arith.cmpi eq, %arg1, %c0_i32 : i32
    %4 = arith.extui %3 : i1 to i32
    %c0_i32_0 = arith.constant 0 : i32
    %5 = arith.cmpi ne, %4, %c0_i32_0 : i32
    scf.if %5 {
      %cst = arith.constant 0.000000e+00 : f32
      %16 = vector.broadcast %cst : f32 to vector<8x8xf32>
      %c0 = arith.constant 0 : index
      %c0_6 = arith.constant 0 : index
      %17 = vector.load %arg6[%c0, %c0_6] : memref<8x8xf32, #tpu.memory_space<vmem>>, vector<8x8xf32>
      tpu.vector_store %arg6[%c0, %c0_6], %16 {strides = array<i32>} : memref<8x8xf32, #tpu.memory_space<vmem>>, vector<8x8xf32>,
      %cst_7 = arith.constant 0.000000e+00 : f32
      %18 = vector.broadcast %cst_7 : f32 to vector<8x8xf32>
      %c0_8 = arith.constant 0 : index
      %c0_9 = arith.constant 0 : index
      %19 = vector.load %arg7[%c0_8, %c0_9] : memref<8x8xf32, #tpu.memory_space<vmem>>, vector<8x8xf32>
      tpu.vector_store %arg7[%c0_8, %c0_9], %18 {strides = array<i32>} : memref<8x8xf32, #tpu.memory_space<vmem>>, vector<8x8xf32>,
    } else {
    }
    %c32_i32_1 = arith.constant 32 : i32
    %6 = arith.addi %2, %c32_i32_1 : i32
    %c30_i32 = arith.constant 30 : i32
    %7 = arith.cmpi sgt, %6, %c30_i32 : i32
    %true = arith.constant true
    %8 = arith.xori %7, %true : i1
    %9 = arith.extui %8 : i1 to i32
    %c0_i32_2 = arith.constant 0 : i32
    %10 = arith.cmpi ne, %9, %c0_i32_2 : i32
    scf.if %10 {
      %c0 = arith.constant 0 : index
      %c0_6 = arith.constant 0 : index
      %16 = vector.load %arg2[%c0, %c0_6] : memref<32x8xf32, #tpu.memory_space<vmem>>, vector<32x8xf32>
      %c0_7 = arith.constant 0 : index
      %c0_8 = arith.constant 0 : index
      %17 = vector.load %arg3[%c0_7, %c0_8] : memref<32x8xf32, #tpu.memory_space<vmem>>, vector<32x8xf32>
      %cst = arith.constant 1.000000e+00 : f32
      %18 = vector.broadcast %cst : f32 to vector<32x8xf32>
      %19 = arith.cmpf oeq, %16, %18 : vector<32x8xf32>
      %20 = math.log %17 : vector<32x8xf32>
      %cst_9 = arith.constant 0.000000e+00 : f32
      %21 = vector.broadcast %cst_9 : f32 to vector<32x8xf32>
      %22 = arith.select %19, %20, %21 : vector<32x8xi1>, vector<32x8xf32>
      %c0_10 = arith.constant 0 : index
      %c0_11 = arith.constant 0 : index
      %23 = vector.load %arg6[%c0_10, %c0_11] : memref<8x8xf32, #tpu.memory_space<vmem>>, vector<8x8xf32>
      %24 = vector.shape_cast %22 : vector<32x8xf32> to vector<4x8x8xf32>
      %cst_12 = arith.constant dense<0.000000e+00> : vector<8x8xf32>
      %25 = vector.multi_reduction <add>, %24, %cst_12 [0] : vector<4x8x8xf32> to vector<8x8xf32>
      %26 = arith.addf %23, %25 : vector<8x8xf32>
      %c0_13 = arith.constant 0 : index
      %c0_14 = arith.constant 0 : index
      %27 = vector.load %arg6[%c0_13, %c0_14] : memref<8x8xf32, #tpu.memory_space<vmem>>, vector<8x8xf32>
      tpu.vector_store %arg6[%c0_13, %c0_14], %26 {strides = array<i32>} : memref<8x8xf32, #tpu.memory_space<vmem>>, vector<8x8xf32>,
      %c0_15 = arith.constant 0 : index
      %c0_16 = arith.constant 0 : index
      %28 = vector.load %arg7[%c0_15, %c0_16] : memref<8x8xf32, #tpu.memory_space<vmem>>, vector<8x8xf32>
      %29 = vector.shape_cast %16 : vector<32x8xf32> to vector<4x8x8xf32>
      %cst_17 = arith.constant dense<0.000000e+00> : vector<8x8xf32>
      %30 = vector.multi_reduction <add>, %29, %cst_17 [0] : vector<4x8x8xf32> to vector<8x8xf32>
      %31 = arith.addf %28, %30 : vector<8x8xf32>
      %c0_18 = arith.constant 0 : index
      %c0_19 = arith.constant 0 : index
      %32 = vector.load %arg7[%c0_18, %c0_19] : memref<8x8xf32, #tpu.memory_space<vmem>>, vector<8x8xf32>
      tpu.vector_store %arg7[%c0_18, %c0_19], %31 {strides = array<i32>} : memref<8x8xf32, #tpu.memory_space<vmem>>, vector<8x8xf32>,
    } else {
    }
    %11 = arith.extui %7 : i1 to i32
    %c0_i32_3 = arith.constant 0 : i32
    %12 = arith.cmpi ne, %11, %c0_i32_3 : i32
    scf.if %12 {
      %c0 = arith.constant 0 : index
      %c0_6 = arith.constant 0 : index
      %16 = vector.load %arg2[%c0, %c0_6] : memref<32x8xf32, #tpu.memory_space<vmem>>, vector<32x8xf32>
      %c0_7 = arith.constant 0 : index
      %c0_8 = arith.constant 0 : index
      %17 = vector.load %arg3[%c0_7, %c0_8] : memref<32x8xf32, #tpu.memory_space<vmem>>, vector<32x8xf32>
      %c0_i32_9 = arith.constant 0 : i32
      %18 = arith.addi %2, %c0_i32_9 : i32
      %19 = tpu.iota {dimensions = array<i32: 0>} : vector<32x8xi32>
      %20 = vector.broadcast %18 : i32 to vector<32x8xi32>
      %21 = arith.addi %20, %19 : vector<32x8xi32>
      %c30_i32_10 = arith.constant 30 : i32
      %22 = vector.broadcast %c30_i32_10 : i32 to vector<32x8xi32>
      %23 = arith.cmpi slt, %21, %22 : vector<32x8xi32>
      %cst = arith.constant 1.000000e+00 : f32
      %24 = vector.broadcast %cst : f32 to vector<32x8xf32>
      %25 = arith.cmpf oeq, %16, %24 : vector<32x8xf32>
      %26 = arith.andi %25, %23 : vector<32x8xi1>
      %cst_11 = arith.constant 0.000000e+00 : f32
      %27 = vector.broadcast %cst_11 : f32 to vector<32x8xf32>
      %28 = arith.select %23, %16, %27 : vector<32x8xi1>, vector<32x8xf32>
      %29 = math.log %17 : vector<32x8xf32>
      %cst_12 = arith.constant 0.000000e+00 : f32
      %30 = vector.broadcast %cst_12 : f32 to vector<32x8xf32>
      %31 = arith.select %26, %29, %30 : vector<32x8xi1>, vector<32x8xf32>
      %c0_13 = arith.constant 0 : index
      %c0_14 = arith.constant 0 : index
      %32 = vector.load %arg6[%c0_13, %c0_14] : memref<8x8xf32, #tpu.memory_space<vmem>>, vector<8x8xf32>
      %33 = vector.shape_cast %31 : vector<32x8xf32> to vector<4x8x8xf32>
      %cst_15 = arith.constant dense<0.000000e+00> : vector<8x8xf32>
      %34 = vector.multi_reduction <add>, %33, %cst_15 [0] : vector<4x8x8xf32> to vector<8x8xf32>
      %35 = arith.addf %32, %34 : vector<8x8xf32>
      %c0_16 = arith.constant 0 : index
      %c0_17 = arith.constant 0 : index
      %36 = vector.load %arg6[%c0_16, %c0_17] : memref<8x8xf32, #tpu.memory_space<vmem>>, vector<8x8xf32>
      tpu.vector_store %arg6[%c0_16, %c0_17], %35 {strides = array<i32>} : memref<8x8xf32, #tpu.memory_space<vmem>>, vector<8x8xf32>,
      %c0_18 = arith.constant 0 : index
      %c0_19 = arith.constant 0 : index
      %37 = vector.load %arg7[%c0_18, %c0_19] : memref<8x8xf32, #tpu.memory_space<vmem>>, vector<8x8xf32>
      %38 = vector.shape_cast %28 : vector<32x8xf32> to vector<4x8x8xf32>
      %cst_20 = arith.constant dense<0.000000e+00> : vector<8x8xf32>
      %39 = vector.multi_reduction <add>, %38, %cst_20 [0] : vector<4x8x8xf32> to vector<8x8xf32>
      %40 = arith.addf %37, %39 : vector<8x8xf32>
      %c0_21 = arith.constant 0 : index
      %c0_22 = arith.constant 0 : index
      %41 = vector.load %arg7[%c0_21, %c0_22] : memref<8x8xf32, #tpu.memory_space<vmem>>, vector<8x8xf32>
      tpu.vector_store %arg7[%c0_21, %c0_22], %40 {strides = array<i32>} : memref<8x8xf32, #tpu.memory_space<vmem>>, vector<8x8xf32>,
    } else {
    }
    %c0_i32_4 = arith.constant 0 : i32
    %13 = arith.cmpi eq, %arg1, %c0_i32_4 : i32
    %14 = arith.extui %13 : i1 to i32
    %c0_i32_5 = arith.constant 0 : i32
    %15 = arith.cmpi ne, %14, %c0_i32_5 : i32
    scf.if %15 {
      %c0 = arith.constant 0 : index
      %c0_6 = arith.constant 0 : index
      %16 = vector.load %arg6[%c0, %c0_6] : memref<8x8xf32, #tpu.memory_space<vmem>>, vector<8x8xf32>
      %17 = vector.shape_cast %16 : vector<8x8xf32> to vector<1x8x8xf32>
      %cst = arith.constant dense<0.000000e+00> : vector<1xf32>
      %18 = vector.multi_reduction <add>, %17, %cst [1, 2] : vector<1x8x8xf32> to vector<1xf32>
      %19 = vector.shape_cast %18 : vector<1xf32> to vector<1x1x1xf32>
      %20 = vector.extract %19[0, 0, 0] : f32 from vector<1x1x1xf32>
      %21 = vector.broadcast %20 : f32 to vector<1x1x1xf32>
      %c0_7 = arith.constant 0 : index
      %c0_8 = arith.constant 0 : index
      %c0_9 = arith.constant 0 : index
      %22 = vector.load %arg4[%c0_7, %c0_8, %c0_9] : memref<1x1x1xf32, #tpu.memory_space<vmem>>, vector<1x1x1xf32>
      tpu.vector_store %arg4[%c0_7, %c0_8, %c0_9], %21 {strides = array<i32>} : memref<1x1x1xf32, #tpu.memory_space<vmem>>, vector<1x1x1xf32>,
      %c0_10 = arith.constant 0 : index
      %c0_11 = arith.constant 0 : index
      %23 = vector.load %arg7[%c0_10, %c0_11] : memref<8x8xf32, #tpu.memory_space<vmem>>, vector<8x8xf32>
      %24 = vector.shape_cast %23 : vector<8x8xf32> to vector<1x8x8xf32>
      %cst_12 = arith.constant dense<0.000000e+00> : vector<1xf32>
      %25 = vector.multi_reduction <add>, %24, %cst_12 [1, 2] : vector<1x8x8xf32> to vector<1xf32>
      %26 = vector.shape_cast %25 : vector<1xf32> to vector<1x1x1xf32>
      %27 = vector.extract %26[0, 0, 0] : f32 from vector<1x1x1xf32>
      %28 = vector.broadcast %27 : f32 to vector<1x1x1xf32>
      %c0_13 = arith.constant 0 : index
      %c0_14 = arith.constant 0 : index
      %c0_15 = arith.constant 0 : index
      %29 = vector.load %arg5[%c0_13, %c0_14, %c0_15] : memref<1x1x1xf32, #tpu.memory_space<vmem>>, vector<1x1x1xf32>
      tpu.vector_store %arg5[%c0_13, %c0_14, %c0_15], %28 {strides = array<i32>} : memref<1x1x1xf32, #tpu.memory_space<vmem>>, vector<1x1x1xf32>,
    } else {
    }
    return
  }
  func.func @transform_0(%arg0: i32, %arg1: i32) -> (i32, i32) {
    %c1_i32 = arith.constant 1 : i32
    %0 = arith.muli %arg0, %c1_i32 : i32
    %1 = arith.addi %0, %arg1 : i32
    %c0_i32 = arith.constant 0 : i32
    %2 = arith.minsi %1, %c0_i32 : i32
    %c0_i32_0 = arith.constant 0 : i32
    %c0_i32_1 = arith.constant 0 : i32
    return %2, %c0_i32_0 : i32, i32
  }
  func.func @transform_1(%arg0: i32, %arg1: i32) -> (i32, i32) {
    %c1_i32 = arith.constant 1 : i32
    %0 = arith.muli %arg0, %c1_i32 : i32
    %1 = arith.addi %0, %arg1 : i32
    %c0_i32 = arith.constant 0 : i32
    %2 = arith.minsi %1, %c0_i32 : i32
    %c0_i32_0 = arith.constant 0 : i32
    %c0_i32_1 = arith.constant 0 : i32
    return %2, %c0_i32_0 : i32, i32
  }
  func.func @transform_2(%arg0: i32, %arg1: i32) -> (i32, i32, i32) {
    %c0_i32 = arith.constant 0 : i32
    %c0_i32_0 = arith.constant 0 : i32
    %c0_i32_1 = arith.constant 0 : i32
    return %arg0, %c0_i32, %c0_i32_0 : i32, i32, i32
  }
  func.func @transform_3(%arg0: i32, %arg1: i32) -> (i32, i32, i32) {
    %c0_i32 = arith.constant 0 : i32
    %c0_i32_0 = arith.constant 0 : i32
    %c0_i32_1 = arith.constant 0 : i32
    return %arg0, %c0_i32, %c0_i32_0 : i32, i32, i32
  }
}

</mosaic_0001>

<bundles_post_ra>
// kernel: tpu_custom_call.1
= control target key start
LH: loop header
LB: loop body
LE: loop exit
PB: predicated region body
PF: predicated region fallthrough
CT: control target
= control target key end

     0   :  { %9 = vsyncpa [#allocation5], 0  ;;  %vm85_vm0 = vcmask 64512   ;;  %v150_v1 = vlaneseq  ;;  %v339_v2 = vmov 0.0   ;;  %s410_s0 = inlined_call_operand.vmem [shape: f32[32,8], index: 0, kind: input, shape index: {}]   ;;  %s411_s1 = inlined_call_operand.vmem [shape: f32[32,8], index: 1, kind: input, shape index: {}]   ;;  %s412_s2 = inlined_call_operand.hbm [shape: f32[1,1,1], index: 2, kind: output, shape index: {0}]   ;;  %s413_s3 = inlined_call_operand.hbm [shape: f32[1,1,1], index: 3, kind: output, shape index: {1}]  }
   0x1   :  { %v142_v0 = vld [vmem:[%s410_s0] sm:$0xff]  ;;  %86 = vst.msk [vmem:[#allocation2] sm:$0xff] %vm85_vm0, %v339_v2  ;;  %v143_v3 = vld [vmem:[%s410_s0 + $0x8] sm:$0xff]  ;;  %87 = vst.msk [vmem:[#allocation3] sm:$0xff] %vm85_vm0, %v339_v2 }
   0x2   :  { %v146_v4 = vld [vmem:[%s411_s1] sm:$0xff]  ;;  %v147_v5 = vld [vmem:[%s411_s1 + $0x8] sm:$0xff]  ;;  %v144_v6 = vld [vmem:[%s410_s0 + $0x10] sm:$0xff]  ;;  %v151_v9 = vshrl.u32 %v150_v1, 7  ;;  %v200_v10 = vsel %vm85_vm0, %v142_v0, 0.0  ;;  %v201_v11 = vsel %vm85_vm0, %v143_v3, 0.0 }
   0x3   :  { %v148_v7 = vld [vmem:[%s411_s1 + $0x10] sm:$0xff]  ;;  %v149_v8 = vld [vmem:[%s411_s1 + $0x18] sm:$0xff]  ;;  %287 = vlog2.f32 %v146_v4  ;;  %v203_v12 = vsel %vm85_vm0, %v144_v6, 0.0 }
   0x4   :  { %289 = vlog2.f32 %v147_v5 }
   0x5   :  { %10 = vsyncpa [#allocation7], 0  ;;  %v154_v13 = vadd.s32 24, %v151_v9  ;;  %291 = vlog2.f32 %v148_v7  ;;  %v202_v14 = vadd.f32 %v201_v11, %v200_v10  ;;  %v145_v15 = vld [vmem:[%s410_s0 + $0x18] sm:$0xff]  ;;  %vm164_vm2 = vcmp.eq.f32.partialorder %v142_v0, 1.0  ;;  %s340_s0 = smov [#allocation4]  }
   0x6   :  { %293 = vlog2.f32 %v149_v8  ;;  %vm167_vm3 = vcmp.eq.f32.partialorder %v145_v15, 1.0  ;;  %vm165_vm4 = vcmp.eq.f32.partialorder %v143_v3, 1.0  ;;  %vm166_vm5 = vcmp.eq.f32.partialorder %v144_v6, 1.0  ;;  %s246_s1 = sshll.u32 %s340_s0, 4  ;;  %s341_s29 = smov [#allocation6]   ;;  %s247_s1 = int_to_ptr.vmem [resolvable:$true] %s246_s1 }
   0x7   :  { %vm163_vm1 = vcmp.lt.s32.totalorder %v154_v13, 30  ;;  %v204_v16 = vadd.f32 %v203_v12, %v202_v14  ;;  %vm225_vm7 = vcmask 0   ;;  %s256_s30 = sshll.u32 %s341_s29, 4  ;;  %s295_s4 = scalar_lea.vmem %s247_s1, 16  ;;  %s257_s30 = int_to_ptr.vmem [resolvable:$true] %s256_s30 }
   0x8   :  { %v175_v17 = vsel %vm163_vm1, %v145_v15, 0.0  ;;  %v199_v18 = vld [vmem:[#allocation3] sm:$0xff]  ;;  %vm171_vm6 = vmand %vm167_vm3, %vm163_vm1  ;;  %v188_v40 = vld [vmem:[#allocation2] sm:$0xff]  ;;  %p296_p0 = scmp.ne.s32.totalorder %s247_s1, %s295_s4  ;;  %s299_s5 = scalar_lea.vmem %s247_s1, 32 }
   0x9   :  { %v205_v19 = vsel %vm85_vm0, %v175_v17, 0.0  ;;  %p300_p1 = scmp.lt.s32.totalorder %s247_s1, %s247_s1  ;;  %p301_p2 = scmp.lt.s32.totalorder %s299_s5, %s295_s4 }
   0xa   :  { %v206_v20 = vadd.f32 %v205_v19, %v204_v16 }
   0xb   :  { %p302_p3 = por %p301_p2, %p300_p1 }
   0xc   :  { %v207_v21 = vadd.f32 %v206_v20, %v199_v18 }
   0xd   :  { %p303_p4 = pnand %p302_p3, %p296_p0 }
   0xe   :  { %208 = vst.msk [vmem:[#allocation3] sm:$0xff] %vm85_vm0, %v207_v21 }
  0x10   :  { %v288_v22 = vpop.eup %287 }
  0x11   :  { %v290_v23 = vpop.eup %289  ;;  %v177_v24 = vmul.f32 0.6931472, %v288_v22 }
  0x12   :  { %v292_v25 = vpop.eup %291  ;;  %v179_v26 = vmul.f32 0.6931472, %v290_v23 }
  0x13   :  { %v294_v27 = vpop.eup %293  ;;  %v181_v28 = vmul.f32 0.6931472, %v292_v25  ;;  %v184_v29 = vsel %vm164_vm2, %v177_v24, 0.0 }
  0x14   :  { %v183_v30 = vmul.f32 0.6931472, %v294_v27  ;;  %v185_v31 = vsel %vm165_vm4, %v179_v26, 0.0  ;;  %v190_v32 = vsel %vm85_vm0, %v184_v29, 0.0 }
  0x15   :  { %v186_v33 = vsel %vm166_vm5, %v181_v28, 0.0  ;;  %v191_v34 = vsel %vm85_vm0, %v185_v31, 0.0  ;;  %v227_v44 = vld [vmem:[#allocation3] sm:$0xff] }
  0x16   :  { %v187_v35 = vsel %vm171_vm6, %v183_v30, 0.0  ;;  %v192_v36 = vadd.f32 %v191_v34, %v190_v32  ;;  %v193_v37 = vsel %vm85_vm0, %v186_v33, 0.0  ;;  %v228_v46 = vsel %vm85_vm0, %v227_v44, 0.0 }
  0x17   :  { %v195_v38 = vsel %vm85_vm0, %v187_v35, 0.0 }
  0x18   :  { %v194_v39 = vadd.f32 %v193_v37, %v192_v36 }
  0x1a   :  { %v196_v41 = vadd.f32 %v195_v38, %v194_v39 }
  0x1c   :  { %v197_v42 = vadd.f32 %v196_v41, %v188_v40 }
  0x1e   :  { %198 = vst.msk [vmem:[#allocation2] sm:$0xff] %vm85_vm0, %v197_v42 }
  0x25   :  { %v212_v43 = vld [vmem:[#allocation2] sm:$0xff] }
  0x26   :  { %v214_v45 = vsel %vm85_vm0, %v212_v43, 0.0 }
  0x27   :  { %215 = vadd.xlane.f32.xlu0 %v214_v45 }
  0x2b   :  { %229 = vadd.xlane.f32.xlu0 %v228_v46 }
  0xb0   :  { %v216_v47 = vpop.xlane.xlu0 %215 }
  0xb1   :  { %v217_v48 = vrot.slane %v216_v47, 4 }
  0xb3   :  { %v218_v49 = vadd.f32 %v217_v48, %v216_v47 }
  0xb4   :  { %v230_v50 = vpop.xlane.xlu0 %229 }
  0xb5   :  { %v219_v51 = vrot.slane %v218_v49, 2  ;;  %v231_v52 = vrot.slane %v230_v50, 4 }
  0xb7   :  { %v232_v53 = vadd.f32 %v231_v52, %v230_v50  ;;  %v220_v54 = vadd.f32 %v219_v51, %v218_v49 }
  0xb9   :  { %v233_v55 = vrot.slane %v232_v53, 2  ;;  %v221_v56 = vrot.slane %v220_v54, 1 }
  0xbb   :  { %v234_v57 = vadd.f32 %v233_v55, %v232_v53  ;;  %v222_v58 = vadd.f32 %v221_v56, %v220_v54 }
  0xbd   :  { %280 = vpush %v222_v58  ;;  %v235_v59 = vrot.slane %v234_v57, 1 }
  0xbf   :  { %v236_v60 = vadd.f32 %v235_v59, %v234_v57 }
  0xc1   :  { %282 = vpush %v236_v60 }
  0xee   :  { %s281_s28 = spop %280 }
  0xef   :  { %v224_v61 = vstv %s281_s28 }
  0xf0   :  { %226 = vst.msk [vmem:[#allocation4] sm:$0x1] %vm225_vm7, %v224_v61 }
  0xf1   :  { %306 = shalt.err (!%p303_p4)
}
  0xf2   :  { %249 = dma.vmem_to_hbm [thread:$0]  %s247_s1, 16, %s412_s2, [#allocation5]  }
  0xf3   :  { %s283_s8 = spop %282  ;;  %s315_s9 = scalar_lea.vmem %s257_s30, 16 }
  0xf4   :  { %v238_v62 = vstv %s283_s8  ;;  %p316_p5 = scmp.ne.s32.totalorder %s257_s30, %s315_s9  ;;  %s319_s10 = scalar_lea.vmem %s257_s30, 32 }
  0xf5   :  { %239 = vst.msk [vmem:[#allocation6] sm:$0x1] %vm225_vm7, %v238_v62  ;;  %p320_p6 = scmp.lt.s32.totalorder %s257_s30, %s257_s30  ;;  %p321_p7 = scmp.lt.s32.totalorder %s319_s10, %s315_s9 }
  0xf7   :  { %p322_p8 = por %p321_p7, %p320_p6 }
  0xf9   :  { %p323_p9 = pnand %p322_p8, %p316_p5 }
  0xfb   :  { %326 = shalt.err (!%p323_p9)
}
  0xfc   :  { %259 = dma.vmem_to_hbm [thread:$0]  %s257_s30, 16, %s413_s3, [#allocation7]  }
  0xfd   :  { %335 = dma.done.wait [#allocation5], 16  }
  0xfe   :  { %336 = vsyncadd [#allocation5], 4294967280 }
  0xff   :  { %337 = dma.done.wait [#allocation7], 16  }
 0x100   :  { %338 = vsyncadd [#allocation7], 4294967280 }
 0x101   :  { %266 = vsyncpa [#allocation5], 1 }
 0x102   :  { %267 = vsyncpa [#allocation7], 1 }

</bundles_post_ra>
